<compile_context>
chip_gen: v7x
topology: tpu7x:2x2x1
jax: 0.10.0
libtpu: 0.0.40
codegen_flags: <defaults>
</compile_context>

<pallas_src>
import functools

import jax
import jax.numpy as jnp
from jax.experimental import pallas as pl
from jax.experimental.pallas import tpu as pltpu

# (in_features, out_features) per layer, matching nn.Linear(128,64) ... (4,2)
LAYER_DIMS = [(128, 64), (64, 32), (32, 16), (16, 8), (8, 4), (4, 2)]
_FLOPS_PER_ROW = 2 * sum(di * do for di, do in LAYER_DIMS)       # = 2 * 10920
_PARAM_BYTES = 4 * sum(di * do + do for di, do in LAYER_DIMS)    # ~44 KiB


def _round_up(x, m):
    return ((x + m - 1) // m) * m


def _mlp_kernel(x_ref,
                w1_ref, b1_ref,
                w2_ref, b2_ref,
                w3_ref, b3_ref,
                w4_ref, b4_ref,
                w5_ref, b5_ref,
                w6_ref, b6_ref,
                o_ref,
                *, compute_dtype):
    """Fused 6-layer MLP. All layers + ReLUs run on one batch tile in VMEM."""

    def linear(h, w_ref, b_ref):
        # MXU matmul (bf16 or f32) with explicit f32 accumulation; bias in f32.
        return jnp.dot(h.astype(compute_dtype),
                       w_ref[...].astype(compute_dtype),
                       preferred_element_type=jnp.float32) + b_ref[...]

    h = x_ref[...]
    h = jnp.maximum(linear(h, w1_ref, b1_ref), 0.0)
    h = jnp.maximum(linear(h, w2_ref, b2_ref), 0.0)
    h = jnp.maximum(linear(h, w3_ref, b3_ref), 0.0)
    h = jnp.maximum(linear(h, w4_ref, b4_ref), 0.0)
    h = jnp.maximum(linear(h, w5_ref, b5_ref), 0.0)
    h = linear(h, w6_ref, b6_ref)          # fc6: no activation
    o_ref[...] = h.astype(o_ref.dtype)


@functools.partial(jax.jit, static_argnames=("batch_tile", "compute_dtype"))
def quantum_neural_network(x, params, batch_tile=512,
                           compute_dtype=jnp.bfloat16):
    """x: (B, 128) float32.  params: flat list [w1, b1, ..., w6, b6]."""
    B, D_in = x.shape
    assert D_in == 128
    D_out = LAYER_DIMS[-1][1]

    # Cast activations at the boundary: halves HBM traffic on the dominant
    # input when compute_dtype is bf16 (precision tradeoff; see header note).
    x = x.astype(compute_dtype)
    x_bytes = jnp.dtype(compute_dtype).itemsize

    # Effective tile: clamp to the (rounded-up) batch so tiny batches don't
    # pad to 512 rows; keep it a multiple of 16 (bf16 sublane packing).
    tile = max(16, min(batch_tile, _round_up(B, 16)))
    tile = _round_up(tile, 16)

    # Pad the batch to a tile multiple instead of asserting divisibility; the
    # padded rows compute garbage and are sliced off below.
    padded_B = _round_up(B, tile)
    if padded_B != B:
        x = jnp.pad(x, ((0, padded_B - B), (0, 0)))
    grid = (padded_B // tile,)

    # x / out tiled over the batch; weights & biases use constant index maps
    # so they are DMA'd once and stay resident in VMEM across grid steps.
    x_spec = pl.BlockSpec((tile, D_in), lambda i: (i, 0))
    param_specs = []
    for (din, dout) in LAYER_DIMS:
        param_specs.append(pl.BlockSpec((din, dout), lambda i: (0, 0)))   # W
        param_specs.append(pl.BlockSpec((1, dout), lambda i: (0, 0)))     # b
    # Output stays (tile, 2): lane-sparse, but writeback bytes are negligible
    # (8 B per row) compared with the 128-wide input stream.
    out_spec = pl.BlockSpec((tile, D_out), lambda i: (i, 0))

    cost = pl.CostEstimate(
        flops=int(padded_B * _FLOPS_PER_ROW),
        transcendentals=0,
        bytes_accessed=int(padded_B * (D_in * x_bytes + D_out * 4)
                           + _PARAM_BYTES),
    )

    kernel = functools.partial(_mlp_kernel, compute_dtype=compute_dtype)

    out = pl.pallas_call(
        kernel,
        out_shape=jax.ShapeDtypeStruct((padded_B, D_out), jnp.float32),
        grid_spec=pltpu.PrefetchScalarGridSpec(
            num_scalar_prefetch=0,
            grid=grid,
            in_specs=[x_spec] + param_specs,
            out_specs=out_spec,
        ),
        compiler_params=pltpu.CompilerParams(
            dimension_semantics=("parallel",),
        ),
        cost_estimate=cost,
    )(x, *params)

    return out[:B]


def init_params(key):
    """Deterministic init mirroring nn.Linear default (uniform +-1/sqrt(in))."""
    params = []
    for (din, dout) in LAYER_DIMS:
        key, kw, kb = jax.random.split(key, 3)
        bound = 1.0 / jnp.sqrt(jnp.float32(din))
        w = jax.random.uniform(kw, (din, dout), jnp.float32, -bound, bound)
        b = jax.random.uniform(kb, (1, dout), jnp.float32, -bound, bound)
        params += [w, b]
    return params


def reference_mlp(x, params):
    """Plain-JAX f32 reference for correctness checking."""
    h = x
    for li in range(6):
        w, b = params[2 * li], params[2 * li + 1]
        h = h @ w + b
        if li < 5:
            h = jnp.maximum(h, 0.0)
    return h


if __name__ == "__main__":
    key = jax.random.PRNGKey(0)
    key, kx1, kx2 = jax.random.split(key, 3)
    params = init_params(key)

    # Small batch, full-f32 path: bit-faithful semantics of the PyTorch module.
    x_small = jax.random.normal(kx1, (8, 128), jnp.float32)
    out_f32 = jax.block_until_ready(
        quantum_neural_network(x_small, params, compute_dtype=jnp.float32))
    ref_small = reference_mlp(x_small, params)
    assert out_f32.shape == (8, 2)
    assert jnp.allclose(out_f32, ref_small, atol=1e-4, rtol=1e-4)

    # Non-tile-multiple batch with a small tile: exercises padding + the
    # multi-step grid and the default bf16 fast path (looser tolerance).
    x_big = jax.random.normal(kx2, (260, 128), jnp.float32)
    out_bf16 = jax.block_until_ready(
        quantum_neural_network(x_big, params, batch_tile=128,
                               compute_dtype=jnp.bfloat16))
    ref_big = reference_mlp(x_big, params)
    assert out_bf16.shape == (260, 2)
    assert jnp.allclose(out_bf16, ref_big, atol=5e-2, rtol=5e-2)

    print("KERNEL_OK")
</pallas_src>

<mosaic_0001>
module attributes {stable_mosaic.version = 11 : i64} {
  func.func @_mlp_kernel(%arg0: i32, %arg1: memref<16x128xf32, #tpu.memory_space<vmem>>, %arg2: memref<128x64xf32, #tpu.memory_space<vmem>>, %arg3: memref<1x64xf32, #tpu.memory_space<vmem>>, %arg4: memref<64x32xf32, #tpu.memory_space<vmem>>, %arg5: memref<1x32xf32, #tpu.memory_space<vmem>>, %arg6: memref<32x16xf32, #tpu.memory_space<vmem>>, %arg7: memref<1x16xf32, #tpu.memory_space<vmem>>, %arg8: memref<16x8xf32, #tpu.memory_space<vmem>>, %arg9: memref<1x8xf32, #tpu.memory_space<vmem>>, %arg10: memref<8x4xf32, #tpu.memory_space<vmem>>, %arg11: memref<1x4xf32, #tpu.memory_space<vmem>>, %arg12: memref<4x2xf32, #tpu.memory_space<vmem>>, %arg13: memref<1x2xf32, #tpu.memory_space<vmem>>, %arg14: memref<16x2xf32, #tpu.memory_space<vmem>>) attributes {dimension_semantics = [#tpu.dimension_semantics<parallel>], iteration_bounds = array<i64: 1>, scalar_prefetch = 0 : i64, scratch_operands = 0 : i64, tpu.core_type = #tpu.core_type<tc>, window_params = [{transform_indices = @transform_0, window_bounds = array<i64: 16, 128>}, {pipeline_mode = #tpu.pipeline_mode<synchronous>, transform_indices = @transform_1, window_bounds = array<i64: 128, 64>}, {pipeline_mode = #tpu.pipeline_mode<synchronous>, transform_indices = @transform_2, window_bounds = array<i64: 1, 64>}, {pipeline_mode = #tpu.pipeline_mode<synchronous>, transform_indices = @transform_3, window_bounds = array<i64: 64, 32>}, {pipeline_mode = #tpu.pipeline_mode<synchronous>, transform_indices = @transform_4, window_bounds = array<i64: 1, 32>}, {pipeline_mode = #tpu.pipeline_mode<synchronous>, transform_indices = @transform_5, window_bounds = array<i64: 32, 16>}, {pipeline_mode = #tpu.pipeline_mode<synchronous>, transform_indices = @transform_6, window_bounds = array<i64: 1, 16>}, {pipeline_mode = #tpu.pipeline_mode<synchronous>, transform_indices = @transform_7, window_bounds = array<i64: 16, 8>}, {pipeline_mode = #tpu.pipeline_mode<synchronous>, transform_indices = @transform_8, window_bounds = array<i64: 1, 8>}, {pipeline_mode = #tpu.pipeline_mode<synchronous>, transform_indices = @transform_9, window_bounds = array<i64: 8, 4>}, {pipeline_mode = #tpu.pipeline_mode<synchronous>, transform_indices = @transform_10, window_bounds = array<i64: 1, 4>}, {pipeline_mode = #tpu.pipeline_mode<synchronous>, transform_indices = @transform_11, window_bounds = array<i64: 4, 2>}, {pipeline_mode = #tpu.pipeline_mode<synchronous>, transform_indices = @transform_12, window_bounds = array<i64: 1, 2>}, {transform_indices = @transform_13, window_bounds = array<i64: 16, 2>}]} {
    %c0 = arith.constant 0 : index
    %c0_0 = arith.constant 0 : index
    %0 = vector.load %arg1[%c0, %c0_0] : memref<16x128xf32, #tpu.memory_space<vmem>>, vector<16x128xf32>
    %c0_1 = arith.constant 0 : index
    %c0_2 = arith.constant 0 : index
    %1 = vector.load %arg2[%c0_1, %c0_2] : memref<128x64xf32, #tpu.memory_space<vmem>>, vector<128x64xf32>
    %cst = arith.constant dense<0.000000e+00> : vector<16x64xf32>
    %2 = tpu.matmul %0, %1, %cst {dimension_numbers = #tpu.dot_dimension_numbers<[1], [0], [0], [1], [0, 0, 1, 1], [], []>} : vector<16x128xf32>, vector<128x64xf32>, vector<16x64xf32> -> vector<16x64xf32>
    %c0_3 = arith.constant 0 : index
    %c0_4 = arith.constant 0 : index
    %3 = vector.load %arg3[%c0_3, %c0_4] : memref<1x64xf32, #tpu.memory_space<vmem>>, vector<1x64xf32>
    %4 = vector.broadcast %3 : vector<1x64xf32> to vector<16x64xf32>
    %5 = arith.addf %2, %4 : vector<16x64xf32>
    %cst_5 = arith.constant 0.000000e+00 : f32
    %6 = vector.broadcast %cst_5 : f32 to vector<16x64xf32>
    %7 = arith.maximumf %5, %6 : vector<16x64xf32>
    %c0_6 = arith.constant 0 : index
    %c0_7 = arith.constant 0 : index
    %8 = vector.load %arg4[%c0_6, %c0_7] : memref<64x32xf32, #tpu.memory_space<vmem>>, vector<64x32xf32>
    %cst_8 = arith.constant dense<0.000000e+00> : vector<16x32xf32>
    %9 = tpu.matmul %7, %8, %cst_8 {dimension_numbers = #tpu.dot_dimension_numbers<[1], [0], [0], [1], [0, 0, 1, 1], [], []>} : vector<16x64xf32>, vector<64x32xf32>, vector<16x32xf32> -> vector<16x32xf32>
    %c0_9 = arith.constant 0 : index
    %c0_10 = arith.constant 0 : index
    %10 = vector.load %arg5[%c0_9, %c0_10] : memref<1x32xf32, #tpu.memory_space<vmem>>, vector<1x32xf32>
    %11 = vector.broadcast %10 : vector<1x32xf32> to vector<16x32xf32>
    %12 = arith.addf %9, %11 : vector<16x32xf32>
    %cst_11 = arith.constant 0.000000e+00 : f32
    %13 = vector.broadcast %cst_11 : f32 to vector<16x32xf32>
    %14 = arith.maximumf %12, %13 : vector<16x32xf32>
    %c0_12 = arith.constant 0 : index
    %c0_13 = arith.constant 0 : index
    %15 = vector.load %arg6[%c0_12, %c0_13] : memref<32x16xf32, #tpu.memory_space<vmem>>, vector<32x16xf32>
    %cst_14 = arith.constant dense<0.000000e+00> : vector<16x16xf32>
    %16 = tpu.matmul %14, %15, %cst_14 {dimension_numbers = #tpu.dot_dimension_numbers<[1], [0], [0], [1], [0, 0, 1, 1], [], []>} : vector<16x32xf32>, vector<32x16xf32>, vector<16x16xf32> -> vector<16x16xf32>
    %c0_15 = arith.constant 0 : index
    %c0_16 = arith.constant 0 : index
    %17 = vector.load %arg7[%c0_15, %c0_16] : memref<1x16xf32, #tpu.memory_space<vmem>>, vector<1x16xf32>
    %18 = vector.broadcast %17 : vector<1x16xf32> to vector<16x16xf32>
    %19 = arith.addf %16, %18 : vector<16x16xf32>
    %cst_17 = arith.constant 0.000000e+00 : f32
    %20 = vector.broadcast %cst_17 : f32 to vector<16x16xf32>
    %21 = arith.maximumf %19, %20 : vector<16x16xf32>
    %c0_18 = arith.constant 0 : index
    %c0_19 = arith.constant 0 : index
    %22 = vector.load %arg8[%c0_18, %c0_19] : memref<16x8xf32, #tpu.memory_space<vmem>>, vector<16x8xf32>
    %cst_20 = arith.constant dense<0.000000e+00> : vector<16x8xf32>
    %23 = tpu.matmul %21, %22, %cst_20 {dimension_numbers = #tpu.dot_dimension_numbers<[1], [0], [0], [1], [0, 0, 1, 1], [], []>} : vector<16x16xf32>, vector<16x8xf32>, vector<16x8xf32> -> vector<16x8xf32>
    %c0_21 = arith.constant 0 : index
    %c0_22 = arith.constant 0 : index
    %24 = vector.load %arg9[%c0_21, %c0_22] : memref<1x8xf32, #tpu.memory_space<vmem>>, vector<1x8xf32>
    %25 = vector.broadcast %24 : vector<1x8xf32> to vector<16x8xf32>
    %26 = arith.addf %23, %25 : vector<16x8xf32>
    %cst_23 = arith.constant 0.000000e+00 : f32
    %27 = vector.broadcast %cst_23 : f32 to vector<16x8xf32>
    %28 = arith.maximumf %26, %27 : vector<16x8xf32>
    %c0_24 = arith.constant 0 : index
    %c0_25 = arith.constant 0 : index
    %29 = vector.load %arg10[%c0_24, %c0_25] : memref<8x4xf32, #tpu.memory_space<vmem>>, vector<8x4xf32>
    %cst_26 = arith.constant dense<0.000000e+00> : vector<16x4xf32>
    %30 = tpu.matmul %28, %29, %cst_26 {dimension_numbers = #tpu.dot_dimension_numbers<[1], [0], [0], [1], [0, 0, 1, 1], [], []>} : vector<16x8xf32>, vector<8x4xf32>, vector<16x4xf32> -> vector<16x4xf32>
    %c0_27 = arith.constant 0 : index
    %c0_28 = arith.constant 0 : index
    %31 = vector.load %arg11[%c0_27, %c0_28] : memref<1x4xf32, #tpu.memory_space<vmem>>, vector<1x4xf32>
    %32 = vector.broadcast %31 : vector<1x4xf32> to vector<16x4xf32>
    %33 = arith.addf %30, %32 : vector<16x4xf32>
    %cst_29 = arith.constant 0.000000e+00 : f32
    %34 = vector.broadcast %cst_29 : f32 to vector<16x4xf32>
    %35 = arith.maximumf %33, %34 : vector<16x4xf32>
    %c0_30 = arith.constant 0 : index
    %c0_31 = arith.constant 0 : index
    %36 = vector.load %arg12[%c0_30, %c0_31] : memref<4x2xf32, #tpu.memory_space<vmem>>, vector<4x2xf32>
    %cst_32 = arith.constant dense<0.000000e+00> : vector<16x2xf32>
    %37 = tpu.matmul %35, %36, %cst_32 {dimension_numbers = #tpu.dot_dimension_numbers<[1], [0], [0], [1], [0, 0, 1, 1], [], []>} : vector<16x4xf32>, vector<4x2xf32>, vector<16x2xf32> -> vector<16x2xf32>
    %c0_33 = arith.constant 0 : index
    %c0_34 = arith.constant 0 : index
    %38 = vector.load %arg13[%c0_33, %c0_34] : memref<1x2xf32, #tpu.memory_space<vmem>>, vector<1x2xf32>
    %39 = vector.broadcast %38 : vector<1x2xf32> to vector<16x2xf32>
    %40 = arith.addf %37, %39 : vector<16x2xf32>
    %c0_35 = arith.constant 0 : index
    %c0_36 = arith.constant 0 : index
    %41 = vector.load %arg14[%c0_35, %c0_36] : memref<16x2xf32, #tpu.memory_space<vmem>>, vector<16x2xf32>
    tpu.vector_store %arg14[%c0_35, %c0_36], %40 {strides = array<i32>} : memref<16x2xf32, #tpu.memory_space<vmem>>, vector<16x2xf32>,
    return
  }
  func.func @transform_0(%arg0: i32) -> (i32, i32) {
    %c0_i32 = arith.constant 0 : i32
    %c0_i32_0 = arith.constant 0 : i32
    return %arg0, %c0_i32 : i32, i32
  }
  func.func @transform_1(%arg0: i32) -> (i32, i32) {
    %c0_i32 = arith.constant 0 : i32
    %c0_i32_0 = arith.constant 0 : i32
    %c0_i32_1 = arith.constant 0 : i32
    return %c0_i32, %c0_i32_0 : i32, i32
  }
  func.func @transform_2(%arg0: i32) -> (i32, i32) {
    %c0_i32 = arith.constant 0 : i32
    %c0_i32_0 = arith.constant 0 : i32
    %c0_i32_1 = arith.constant 0 : i32
    return %c0_i32, %c0_i32_0 : i32, i32
  }
  func.func @transform_3(%arg0: i32) -> (i32, i32) {
    %c0_i32 = arith.constant 0 : i32
    %c0_i32_0 = arith.constant 0 : i32
    %c0_i32_1 = arith.constant 0 : i32
    return %c0_i32, %c0_i32_0 : i32, i32
  }
  func.func @transform_4(%arg0: i32) -> (i32, i32) {
    %c0_i32 = arith.constant 0 : i32
    %c0_i32_0 = arith.constant 0 : i32
    %c0_i32_1 = arith.constant 0 : i32
    return %c0_i32, %c0_i32_0 : i32, i32
  }
  func.func @transform_5(%arg0: i32) -> (i32, i32) {
    %c0_i32 = arith.constant 0 : i32
    %c0_i32_0 = arith.constant 0 : i32
    %c0_i32_1 = arith.constant 0 : i32
    return %c0_i32, %c0_i32_0 : i32, i32
  }
  func.func @transform_6(%arg0: i32) -> (i32, i32) {
    %c0_i32 = arith.constant 0 : i32
    %c0_i32_0 = arith.constant 0 : i32
    %c0_i32_1 = arith.constant 0 : i32
    return %c0_i32, %c0_i32_0 : i32, i32
  }
  func.func @transform_7(%arg0: i32) -> (i32, i32) {
    %c0_i32 = arith.constant 0 : i32
    %c0_i32_0 = arith.constant 0 : i32
    %c0_i32_1 = arith.constant 0 : i32
    return %c0_i32, %c0_i32_0 : i32, i32
  }
  func.func @transform_8(%arg0: i32) -> (i32, i32) {
    %c0_i32 = arith.constant 0 : i32
    %c0_i32_0 = arith.constant 0 : i32
    %c0_i32_1 = arith.constant 0 : i32
    return %c0_i32, %c0_i32_0 : i32, i32
  }
  func.func @transform_9(%arg0: i32) -> (i32, i32) {
    %c0_i32 = arith.constant 0 : i32
    %c0_i32_0 = arith.constant 0 : i32
    %c0_i32_1 = arith.constant 0 : i32
    return %c0_i32, %c0_i32_0 : i32, i32
  }
  func.func @transform_10(%arg0: i32) -> (i32, i32) {
    %c0_i32 = arith.constant 0 : i32
    %c0_i32_0 = arith.constant 0 : i32
    %c0_i32_1 = arith.constant 0 : i32
    return %c0_i32, %c0_i32_0 : i32, i32
  }
  func.func @transform_11(%arg0: i32) -> (i32, i32) {
    %c0_i32 = arith.constant 0 : i32
    %c0_i32_0 = arith.constant 0 : i32
    %c0_i32_1 = arith.constant 0 : i32
    return %c0_i32, %c0_i32_0 : i32, i32
  }
  func.func @transform_12(%arg0: i32) -> (i32, i32) {
    %c0_i32 = arith.constant 0 : i32
    %c0_i32_0 = arith.constant 0 : i32
    %c0_i32_1 = arith.constant 0 : i32
    return %c0_i32, %c0_i32_0 : i32, i32
  }
  func.func @transform_13(%arg0: i32) -> (i32, i32) {
    %c0_i32 = arith.constant 0 : i32
    %c0_i32_0 = arith.constant 0 : i32
    return %arg0, %c0_i32 : i32, i32
  }
}

</mosaic_0001>

<bundles_post_ra>
// kernel: quantum_neural_network.1
= control target key start
LH: loop header
LB: loop body
LE: loop exit
PB: predicated region body
PF: predicated region fallthrough
CT: control target
= control target key end

     0   :  { %vm161_vm0 = vcmask 523264   ;;  %vm256_vm1 = vcmask 261120   ;;  %vm349_vm2 = vcmask 130048   ;;  %vm441_vm3 = vcmask 64512   ;;  %s1025_s1 = inlined_call_operand.vmem [shape: f32[128,64], index: 1, kind: input, shape index: {}]   ;;  %s1026_s0 = inlined_call_operand.vmem [shape: f32[16,128], index: 0, kind: input, shape index: {}]   ;;  %s1027_s3 = inlined_call_operand.vmem [shape: f32[64,32], index: 3, kind: input, shape index: {}]   ;;  %s1028_s5 = inlined_call_operand.vmem [shape: f32[32,16], index: 5, kind: input, shape index: {}]   ;;  %s1029_s2 = inlined_call_operand.vmem [shape: f32[1,64], index: 2, kind: input, shape index: {}]   ;;  %s1030_s4 = inlined_call_operand.vmem [shape: f32[1,32], index: 4, kind: input, shape index: {}]   ;;  %s1031_s7 = inlined_call_operand.vmem [shape: f32[16,8], index: 7, kind: input, shape index: {}]   ;;  %s1032_s6 = inlined_call_operand.vmem [shape: f32[1,16], index: 6, kind: input, shape index: {}]   ;;  %s1033_s9 = inlined_call_operand.vmem [shape: f32[8,4], index: 9, kind: input, shape index: {}]   ;;  %s1034_s8 = inlined_call_operand.vmem [shape: f32[1,8], index: 8, kind: input, shape index: {}]   ;;  %s1035_s11 = inlined_call_operand.vmem [shape: f32[4,2], index: 11, kind: input, shape index: {}]   ;;  %s1036_s10 = inlined_call_operand.vmem [shape: f32[1,4], index: 10, kind: input, shape index: {}]   ;;  %s1037_s12 = inlined_call_operand.vmem [shape: f32[1,2], index: 12, kind: input, shape index: {}]   ;;  %s1038_s13 = inlined_call_operand.vmem [shape: f32[16,2], index: 13, kind: output, shape index: {}]  }
   0x1   :  { %v46_v0 = vld [vmem:[%s1025_s1] sm:$0xff]  ;;  %v47_v1 = vld [vmem:[%s1025_s1 + $0x8] sm:$0xff]  ;;  %v48_v2 = vld [vmem:[%s1025_s1 + $0x10] sm:$0xff]  ;;  %vm540_vm4 = vcmask 1043456   ;;  %vm533_vm5 = vcmask 31744   ;;  %vm619_vm6 = vcmask 15360  }
   0x2   :  { %v769_v3 = vpack.c.bf16 %v47_v1, %v46_v0  ;;  %v49_v4 = vld [vmem:[%s1025_s1 + $0x18] sm:$0xff]  ;;  %v50_v6 = vld [vmem:[%s1025_s1 + $0x20] sm:$0xff]  ;;  %v51_v7 = vld [vmem:[%s1025_s1 + $0x28] sm:$0xff] }
   0x3   :  { %v773_v5 = vpack.c.bf16 %v49_v4, %v48_v2  ;;  %v777_v8 = vpack.c.bf16 %v51_v7, %v50_v6  ;;  %v52_v9 = vld [vmem:[%s1025_s1 + $0x30] sm:$0xff]  ;;  %v53_v10 = vld [vmem:[%s1025_s1 + $0x38] sm:$0xff]  ;;  %v44_v11 = vld [vmem:[%s1026_s0] sm:$0xff] }
   0x4   :  { %770 = vmatprep.subr.bf16.mxu0 %v769_v3  ;;  %719 = vmatprep.mubr.f32.mxu0 %v44_v11  ;;  %v146_v12 = vld [vmem:[%s1027_s3] sm:$0xff]  ;;  %v147_v13 = vld [vmem:[%s1027_s3 + $0x8] sm:$0xff]  ;;  %v148_v14 = vld [vmem:[%s1027_s3 + $0x10] sm:$0xff]  ;;  %v781_v20 = vpack.c.bf16 %v53_v10, %v52_v9 }
   0x5   :  { %772 = vmatpush3.bf16.msra.mxu0 %v769_v3  ;;  %v801_v15 = vpack.c.bf16 %v147_v13, %v146_v12  ;;  %v149_v16 = vld [vmem:[%s1027_s3 + $0x18] sm:$0xff]  ;;  %v150_v18 = vld [vmem:[%s1027_s3 + $0x20] sm:$0xff]  ;;  %v151_v19 = vld [vmem:[%s1027_s3 + $0x28] sm:$0xff] }
   0x6   :  { %774 = vmatprep.subr.bf16.mxu0 %v773_v5  ;;  %v805_v17 = vpack.c.bf16 %v149_v16, %v148_v14  ;;  %v54_v21 = vld [vmem:[%s1025_s1 + $0x40] sm:$0xff]  ;;  %v55_v22 = vld [vmem:[%s1025_s1 + $0x48] sm:$0xff]  ;;  %v809_v23 = vpack.c.bf16 %v151_v19, %v150_v18  ;;  %v56_v25 = vld [vmem:[%s1025_s1 + $0x50] sm:$0xff] }
   0x7   :  { %802 = vmatprep.subr.bf16.mxu1 %v801_v15  ;;  %v785_v24 = vpack.c.bf16 %v55_v22, %v54_v21  ;;  %v57_v26 = vld [vmem:[%s1025_s1 + $0x58] sm:$0xff]  ;;  %v58_v28 = vld [vmem:[%s1025_s1 + $0x60] sm:$0xff]  ;;  %v59_v29 = vld [vmem:[%s1025_s1 + $0x68] sm:$0xff] }
   0x8   :  { %804 = vmatpush3.bf16.msra.mxu1 %v801_v15  ;;  %v789_v27 = vpack.c.bf16 %v57_v26, %v56_v25  ;;  %v793_v30 = vpack.c.bf16 %v59_v29, %v58_v28  ;;  %v60_v31 = vld [vmem:[%s1025_s1 + $0x70] sm:$0xff]  ;;  %v61_v32 = vld [vmem:[%s1025_s1 + $0x78] sm:$0xff]  ;;  %v45_v34 = vld [vmem:[%s1026_s0 + $0x8] sm:$0xff] }
   0x9   :  { %776 = vmatpush3.bf16.msra.mxu0 %v773_v5  ;;  %806 = vmatprep.subr.bf16.mxu1 %v805_v17  ;;  %v797_v33 = vpack.c.bf16 %v61_v32, %v60_v31  ;;  %v152_v35 = vld [vmem:[%s1027_s3 + $0x30] sm:$0xff]  ;;  %v153_v36 = vld [vmem:[%s1027_s3 + $0x38] sm:$0xff]  ;;  %v245_v38 = vld [vmem:[%s1028_s5] sm:$0xff] }
   0xa   :  { %778 = vmatprep.subr.bf16.mxu0 %v777_v8  ;;  %v813_v37 = vpack.c.bf16 %v153_v36, %v152_v35  ;;  %v246_v39 = vld [vmem:[%s1028_s5 + $0x8] sm:$0xff]  ;;  %v626_v41 = vld [vmem:[%s1029_s2] ss:$0 sm:$0xff]  ;;  %v247_v48 = vld [vmem:[%s1028_s5 + $0x10] sm:$0xff] }
   0xb   :  { %v817_v40 = vpack.c.bf16 %v246_v39, %v245_v38  ;;  %v248_v49 = vld [vmem:[%s1028_s5 + $0x18] sm:$0xff]  ;;  %v627_v51 = vld [vmem:[%s1030_s4] ss:$0 sm:$0xff]  ;;  %v341_v59 = vld [vmem:[%s1031_s7 + $0x8] sm:$0xff] }
   0xc   :  { %808 = vmatpush3.bf16.msra.mxu1 %v805_v17  ;;  %v821_v50 = vpack.c.bf16 %v248_v49, %v247_v48  ;;  %v340_v58 = vld [vmem:[%s1031_s7] sm:$0xff] }
   0xd   :  { %780 = vmatpush3.bf16.msra.mxu0 %v777_v8  ;;  %810 = vmatprep.subr.bf16.mxu1 %v809_v23  ;;  %v825_v60 = vpack.c.bf16 %v341_v59, %v340_v58  ;;  %v630_v61 = vld [vmem:[%s1032_s6] ss:$0 sm:$0xff] }
   0xe   :  { %782 = vmatprep.subr.bf16.mxu0 %v781_v20  ;;  %v433_v4 = vld [vmem:[%s1033_s9] sm:$0xff] }
   0xf   :  { %v633_v5 = vld [vmem:[%s1034_s8] ss:$0 sm:$0xff] }
  0x10   :  { %812 = vmatpush3.bf16.msra.mxu1 %v809_v23  ;;  %v525_v12 = vld [vmem:[%s1035_s11] sm:$0xf] }
  0x11   :  { %784 = vmatpush3.bf16.msra.mxu0 %v781_v20  ;;  %814 = vmatprep.subr.bf16.mxu1 %v813_v37  ;;  %v636_v13 = vld [vmem:[%s1036_s10] ss:$0 sm:$0xff] }
  0x12   :  { %786 = vmatprep.subr.bf16.mxu0 %v785_v24  ;;  %v639_v20 = vld [vmem:[%s1037_s12] ss:$0 sm:$0xff] }
  0x14   :  { %816 = vmatpush3.bf16.msra.mxu1 %v813_v37 }
  0x15   :  { %788 = vmatpush3.bf16.msra.mxu0 %v785_v24  ;;  %818 = vmatprep.subr.bf16.mxu1 %v817_v40 }
  0x16   :  { %790 = vmatprep.subr.bf16.mxu0 %v789_v27 }
  0x19   :  { %792 = vmatpush3.bf16.msra.mxu0 %v789_v27 }
  0x1a   :  { %794 = vmatprep.subr.bf16.mxu0 %v793_v30 }
  0x1d   :  { %796 = vmatpush3.bf16.msra.mxu0 %v793_v30 }
  0x1e   :  { %798 = vmatprep.subr.bf16.mxu0 %v797_v33 }
  0x21   :  { %800 = vmatpush3.bf16.msra.mxu0 %v797_v33 }
  0x22   :  { %764 = vmatprep.subr.msk.mxu0 %vm540_vm4, %v525_v12 }
  0x24   :  { %720 = vmatmul.mubr.f32.vlgmr.msra.gmra.mrb[0].mxu0 %v45_v34 }
  0x25   :  { %765 = vmatpush3.msk.msra.mxu0 %vm540_vm4, %v525_v12 }
  0xf7   :  { %v721_v42 = vpop.f32.mrb[0].mxu0 }
  0xf8   :  { %v141_v43 = vadd.f32 %v721_v42, %v626_v41  ;;  %v135_v44 = vpop.f32.mrb[1].mxu0 }
  0xf9   :  { %v136_v45 = vadd.f32 %v626_v41, %v135_v44 }
  0xfa   :  { %v145_v47 = vmax.f32 %v141_v43, 0.0 }
  0xfb   :  { %v144_v46 = vmax.f32 %v136_v45, 0.0 }
  0xfd   :  { %738 = vmatprep.mubr.msk.f32.mxu1 %vm161_vm0, %v144_v46 }
  0xfe   :  { %739 = vmatmul.mubr.msk.f32.vlgmr.msra.gmra.mrb[0].mxu1 %vm161_vm0, %v145_v47 }
  0xff   :  { %820 = vmatpush3.bf16.msra.mxu1 %v817_v40 }
 0x100   :  { %822 = vmatprep.subr.bf16.mxu1 %v821_v50 }
 0x103   :  { %824 = vmatpush3.bf16.msra.mxu1 %v821_v50 }
 0x104   :  { %826 = vmatprep.subr.bf16.mxu1 %v825_v60 }
 0x1d1   :  { %v740_v52 = vpop.f32.mrb[0].mxu1 }
 0x1d2   :  { %v240_v53 = vadd.f32 %v740_v52, %v627_v51  ;;  %v234_v54 = vpop.f32.mrb[1].mxu1 }
 0x1d3   :  { %v235_v55 = vadd.f32 %v627_v51, %v234_v54 }
 0x1d4   :  { %v244_v57 = vmax.f32 %v240_v53, 0.0 }
 0x1d5   :  { %v243_v56 = vmax.f32 %v235_v55, 0.0 }
 0x1d7   :  { %749 = vmatprep.mubr.msk.f32.mxu1 %vm256_vm1, %v243_v56 }
 0x1d8   :  { %750 = vmatmul.mubr.msk.f32.vlgmr.msra.gmra.mrb[2].mxu1 %vm256_vm1, %v244_v57 }
 0x1d9   :  { %828 = vmatpush3.bf16.msra.mxu1 %v825_v60 }
 0x1da   :  { %759 = vmatprep.subr.mxu1 %v433_v4 }
 0x2ab   :  { %v751_v62 = vpop.f32.mrb[2].mxu1 }
 0x2ac   :  { %v335_v63 = vadd.f32 %v751_v62, %v630_v61  ;;  %v329_v0 = vpop.f32.mrb[3].mxu1 }
 0x2ad   :  { %v330_v1 = vadd.f32 %v630_v61, %v329_v0 }
 0x2ae   :  { %v339_v3 = vmax.f32 %v335_v63, 0.0 }
 0x2af   :  { %v338_v2 = vmax.f32 %v330_v1, 0.0 }
 0x2b1   :  { %756 = vmatprep.mubr.msk.f32.mxu1 %vm349_vm2, %v338_v2 }
 0x2b2   :  { %757 = vmatmul.mubr.msk.f32.vlgmr.msra.gmra.mrb[4].mxu1 %vm349_vm2, %v339_v3 }
 0x2b3   :  { %760 = vmatpush3.msra.mxu1 %v433_v4 }
 0x385   :  { %v758_v6 = vpop.f32.mrb[4].mxu1 }
 0x386   :  { %v428_v7 = vadd.f32 %v758_v6, %v633_v5  ;;  %v422_v8 = vpop.f32.mrb[5].mxu1 }
 0x387   :  { %v423_v9 = vadd.f32 %v633_v5, %v422_v8 }
 0x388   :  { %v432_v11 = vmax.f32 %v428_v7, 0.0 }
 0x389   :  { %v431_v10 = vmax.f32 %v423_v9, 0.0 }
 0x38b   :  { %761 = vmatprep.mubr.msk.f32.mxu1 %vm441_vm3, %v431_v10 }
 0x38c   :  { %762 = vmatmul.mubr.msk.f32.vlgmr.msra.gmra.mrb[6].mxu1 %vm441_vm3, %v432_v11 }
 0x45f   :  { %v763_v14 = vpop.f32.mrb[6].mxu1 }
 0x460   :  { %v520_v15 = vadd.f32 %v763_v14, %v636_v13  ;;  %v514_v16 = vpop.f32.mrb[7].mxu1 }
 0x461   :  { %v515_v17 = vadd.f32 %v636_v13, %v514_v16 }
 0x462   :  { %v524_v19 = vmax.f32 %v520_v15, 0.0 }
 0x463   :  { %v523_v18 = vmax.f32 %v515_v17, 0.0 }
 0x465   :  { %766 = vmatprep.mubr.msk.f32.mxu0 %vm533_vm5, %v523_v18 }
 0x466   :  { %767 = vmatmul.mubr.msk.f32.vlgmr.msra.gmra.mrb[2].mxu0 %vm533_vm5, %v524_v19 }
 0x539   :  { %v768_v21 = vpop.f32.mrb[2].mxu0 }
 0x53a   :  { %v616_v22 = vadd.f32 %v768_v21, %v639_v20  ;;  %v610_v23 = vpop.f32.mrb[3].mxu0 }
 0x53b   :  { %v611_v24 = vadd.f32 %v639_v20, %v610_v23 }
 0x53c   :  { %621 = vst.msk [vmem:[%s1038_s13 + $0x8] sm:$0xff] %vm619_vm6, %v616_v22 }
 0x53d   :  { %620 = vst.msk [vmem:[%s1038_s13] sm:$0xff] %vm619_vm6, %v611_v24 }

</bundles_post_ra>
